<compile_context>
chip_gen: v7x
topology: tpu7x:2x2x1
jax: 0.10.0
libtpu: 0.0.40
codegen_flags: <defaults>
</compile_context>

<pallas_src>
import functools
import math

import jax
import jax.numpy as jnp
from jax.experimental import pallas as pl
from jax.experimental.pallas import tpu as pltpu


# ----------------------------- Pallas kernels ------------------------------ #

_SINGLE_SHOT_VMEM_BUDGET = 16 * 1024 * 1024  # bytes; well under scoped VMEM on v5e/v6e/v7x


def _single_shot_kernel(x_ref, mt_ref, b_ref, o_ref, *, apply_relu, n_scales):
    """Fast path: every scale in ONE grid-less invocation (tiny footprint).

    x_ref  : (S, B, K)  flattened enc_out rows (K = d_model*enc_in, lane axis)
    mt_ref : (S, K, K)  fused (channel-mix + shuffle) matrices, pre-transposed
    b_ref  : (S, 1, K)  fused biases
    o_ref  : (S, B, K)  flattened dec_out rows
    """
    for s in range(n_scales):  # static unroll; S is small (down_sampling_layers + 1)
        y = jnp.dot(x_ref[s], mt_ref[s], preferred_element_type=jnp.float32)
        y = y + b_ref[s]
        if apply_relu:
            y = jnp.maximum(y, 0.0)
        o_ref[s] = y.astype(o_ref.dtype)


def _per_scale_kernel(x_ref, mt_ref, b_ref, o_ref, *, apply_relu):
    """Pipelined path: one grid step == one scale (used when operands are large)."""
    y = jnp.dot(x_ref[...], mt_ref[...], preferred_element_type=jnp.float32)
    y = y + b_ref[...]
    if apply_relu:
        y = jnp.maximum(y, 0.0)
    o_ref[...] = y.astype(o_ref.dtype)


def _fused_encoder_pallas(x_stacked, mt_stacked, b_stacked, apply_relu):
    """x_stacked: (S, B, K), mt_stacked: (S, K, K), b_stacked: (S, 1, K)."""
    S, B, K = x_stacked.shape
    itemsize = jnp.dtype(x_stacked.dtype).itemsize
    footprint = (2 * x_stacked.size + mt_stacked.size + b_stacked.size) * itemsize

    if footprint <= _SINGLE_SHOT_VMEM_BUDGET:
        # Grid-less call: whole arrays resident in VMEM, one launch, no per-step
        # pipeline overhead (dominant cost at these tiny shapes).
        return pl.pallas_call(
            functools.partial(_single_shot_kernel,
                              apply_relu=apply_relu, n_scales=S),
            out_shape=jax.ShapeDtypeStruct((S, B, K), x_stacked.dtype),
        )(x_stacked, mt_stacked, b_stacked)

    # Large-footprint path: grid over scales, BlockSpec double-buffers the next
    # scale's weights; "parallel" lets v7x's 2 TensorCores split scales.
    return pl.pallas_call(
        functools.partial(_per_scale_kernel, apply_relu=apply_relu),
        out_shape=jax.ShapeDtypeStruct((S, B, K), x_stacked.dtype),
        grid=(S,),
        in_specs=[
            pl.BlockSpec((None, B, K), lambda s: (s, 0, 0)),   # per-scale activations
            pl.BlockSpec((None, K, K), lambda s: (s, 0, 0)),   # per-scale fused weight
            pl.BlockSpec((None, 1, K), lambda s: (s, 0, 0)),   # per-scale fused bias
        ],
        out_specs=pl.BlockSpec((None, B, K), lambda s: (s, 0, 0)),
        compiler_params=pltpu.CompilerParams(
            dimension_semantics=("parallel",)),
    )(x_stacked, mt_stacked, b_stacked)


# ------------------------------ Module port -------------------------------- #

class Configs:
    def __init__(self, d_model=32, enc_in=4, down_sampling_layers=2,
                 use_linear=1, use_relu=1):
        self.d_model = d_model
        self.enc_in = enc_in
        self.down_sampling_layers = down_sampling_layers
        self.use_linear = use_linear
        self.use_relu = use_relu


def init_params(cfg, key):
    """Deterministic nn.Linear-style init: U(-1/sqrt(fan_in), 1/sqrt(fan_in))."""
    params = []
    bound = 1.0 / math.sqrt(cfg.d_model)
    for _ in range(cfg.down_sampling_layers + 1):
        key, kw, kb = jax.random.split(key, 3)
        w = jax.random.uniform(kw, (cfg.d_model, cfg.d_model),
                               minval=-bound, maxval=bound, dtype=jnp.float32)
        b = jax.random.uniform(kb, (cfg.d_model,),
                               minval=-bound, maxval=bound, dtype=jnp.float32)
        params.append((w, b))
    return params


def prepare_fused_params(params, cfg):
    """One-time, hoisted out of the forward path (no per-forward transposes).

    Folds, per scale, the exact chain
        A[b,d,n]   = sum_e W[d,e]*enc[b,e,n] + bias[d]          (Linear in ch-first)
        dec[b,j,i] = A_flat[b, i*D + j]                          (reshape + permute)
    into   out_flat = enc_flat @ Mt + bvec   with K = D*N lanes:
        M  = kron(W, I_N)[perm, :],  perm[k] = (k % N) * D + (k // N)
        bv = repeat(bias, N)[perm]
    use_linear == 0 folds an identity W / zero bias (pure shuffle path).
    """
    D, N = cfg.d_model, cfg.enc_in
    K = D * N
    eye_n = jnp.eye(N, dtype=jnp.float32)
    k = jnp.arange(K)
    perm = (k % N) * D + (k // N)
    mts, bvs = [], []
    for (w, b) in params:
        if cfg.use_linear != 1:
            w = jnp.eye(D, dtype=jnp.float32)
            b = jnp.zeros((D,), dtype=jnp.float32)
        m = jnp.kron(w, eye_n)[perm, :]          # (K, K) fused mix + shuffle
        bv = jnp.repeat(b, N)[perm]              # (K,)
        mts.append(jnp.transpose(m))             # pre-transposed: kernel does x @ Mt
        bvs.append(bv.reshape(1, K))
    return jnp.stack(mts), jnp.stack(bvs)        # (S, K, K), (S, 1, K)


@functools.partial(jax.jit, static_argnames=("apply_relu",))
def _forward_impl(enc_tuple, mt_stacked, b_stacked, *, apply_relu):
    B, D, N = enc_tuple[0].shape
    K = D * N
    S = len(enc_tuple)
    # Contiguous flatten (no data movement) + one tiny stack; no HBM transposes.
    x = jnp.stack([jnp.reshape(e, (B, K)) for e in enc_tuple])     # (S, B, K)
    y = _fused_encoder_pallas(x, mt_stacked[:S], b_stacked[:S], apply_relu)
    # Contiguous un-flatten back to the module's (B, d_model, enc_in) outputs.
    return tuple(jnp.reshape(y[i], (B, D, N)) for i in range(S))


def local_global_encoder_forward(B, enc_out_list, x_list, fused_params, cfg):
    """Pallas-backed forward matching LocalGlobalEncoder.forward semantics.

    `fused_params` comes from prepare_fused_params (hoisted one-time prep)."""
    del B  # batch is taken from the tensors themselves (identical by construction)
    n = min(len(x_list[0]), len(enc_out_list))   # zip() semantics of the original loop
    mt_stacked, b_stacked = fused_params
    outs = _forward_impl(tuple(enc_out_list[:n]), mt_stacked, b_stacked,
                         apply_relu=(cfg.use_relu == 1))
    return list(outs)


# ------------------------------ Pure-JAX ref -------------------------------- #

def reference_forward(B, enc_out_list, x_list, params, cfg):
    dec_out_list = []
    for i, enc_out in zip(range(len(x_list[0])), enc_out_list):
        if cfg.use_linear == 1:
            w, b = params[i]
            xp = jnp.transpose(enc_out, (0, 2, 1))               # (B, enc_in, d_model)
            y = jnp.einsum("bnd,od->bno", xp, w,
                           precision=jax.lax.Precision.HIGHEST) + b
            dec = jnp.transpose(y, (0, 2, 1))                    # (B, d_model, enc_in)
        else:
            dec = enc_out
        dec = jnp.transpose(
            jnp.reshape(dec, (B, cfg.enc_in, cfg.d_model)), (0, 2, 1))
        if cfg.use_relu == 1:
            dec = jnp.maximum(dec, 0.0)
        dec_out_list.append(dec)
    return dec_out_list


# --------------------------------- main ------------------------------------ #

if __name__ == "__main__":
    cfg = Configs(d_model=32, enc_in=4, down_sampling_layers=2,
                  use_linear=1, use_relu=1)
    B = 2
    n_scales = cfg.down_sampling_layers + 1     # S = 3

    key = jax.random.PRNGKey(0)
    key, pkey = jax.random.split(key)
    params = init_params(cfg, pkey)
    fused_params = prepare_fused_params(params, cfg)   # hoisted one-time prep

    enc_out_list = []
    for _ in range(n_scales):
        key, sub = jax.random.split(key)
        enc_out_list.append(
            jax.random.normal(sub, (B, cfg.d_model, cfg.enc_in), dtype=jnp.float32))
    # x_list[0] is only used for its length in the reference module.
    x_list = [enc_out_list]

    dec_out_list = local_global_encoder_forward(B, enc_out_list, x_list,
                                                fused_params, cfg)
    dec_out_list = [jax.block_until_ready(d) for d in dec_out_list]

    ref_list = reference_forward(B, enc_out_list, x_list, params, cfg)
    for got, ref in zip(dec_out_list, ref_list):
        assert got.shape == (B, cfg.d_model, cfg.enc_in)
        err = float(jnp.max(jnp.abs(got - ref)))
        assert jnp.allclose(got, ref, atol=1e-4, rtol=1e-4), f"max|err|={err}"

    print("KERNEL_OK")
</pallas_src>

<mosaic_0001>
module attributes {stable_mosaic.version = 11 : i64} {
  func.func @_single_shot_kernel(%arg0: memref<3x2x128xf32, #tpu.memory_space<vmem>>, %arg1: memref<3x128x128xf32, #tpu.memory_space<vmem>>, %arg2: memref<3x1x128xf32, #tpu.memory_space<vmem>>, %arg3: memref<3x2x128xf32, #tpu.memory_space<vmem>>) attributes {dimension_semantics = [], scalar_prefetch = 0 : i64, scratch_operands = 0 : i64, tpu.core_type = #tpu.core_type<tc>} {
    %c0 = arith.constant 0 : index
    %c0_0 = arith.constant 0 : index
    %c0_1 = arith.constant 0 : index
    %0 = vector.load %arg0[%c0, %c0_0, %c0_1] : memref<3x2x128xf32, #tpu.memory_space<vmem>>, vector<1x2x128xf32>
    %1 = vector.shape_cast %0 : vector<1x2x128xf32> to vector<2x128xf32>
    %c0_2 = arith.constant 0 : index
    %c0_3 = arith.constant 0 : index
    %c0_4 = arith.constant 0 : index
    %2 = vector.load %arg1[%c0_2, %c0_3, %c0_4] : memref<3x128x128xf32, #tpu.memory_space<vmem>>, vector<1x128x128xf32>
    %3 = vector.shape_cast %2 : vector<1x128x128xf32> to vector<128x128xf32>
    %cst = arith.constant dense<0.000000e+00> : vector<2x128xf32>
    %4 = tpu.matmul %1, %3, %cst {dimension_numbers = #tpu.dot_dimension_numbers<[1], [0], [0], [1], [0, 0, 1, 1], [], []>} : vector<2x128xf32>, vector<128x128xf32>, vector<2x128xf32> -> vector<2x128xf32>
    %c0_5 = arith.constant 0 : index
    %c0_6 = arith.constant 0 : index
    %c0_7 = arith.constant 0 : index
    %5 = vector.load %arg2[%c0_5, %c0_6, %c0_7] : memref<3x1x128xf32, #tpu.memory_space<vmem>>, vector<1x1x128xf32>
    %6 = vector.shape_cast %5 : vector<1x1x128xf32> to vector<1x128xf32>
    %7 = vector.broadcast %6 : vector<1x128xf32> to vector<2x128xf32>
    %8 = arith.addf %4, %7 : vector<2x128xf32>
    %cst_8 = arith.constant 0.000000e+00 : f32
    %9 = vector.broadcast %cst_8 : f32 to vector<2x128xf32>
    %10 = arith.maximumf %8, %9 : vector<2x128xf32>
    %c0_9 = arith.constant 0 : index
    %c0_10 = arith.constant 0 : index
    %c0_11 = arith.constant 0 : index
    %11 = vector.load %arg3[%c0_9, %c0_10, %c0_11] : memref<3x2x128xf32, #tpu.memory_space<vmem>>, vector<1x2x128xf32>
    %12 = vector.shape_cast %11 : vector<1x2x128xf32> to vector<2x128xf32>
    %13 = vector.shape_cast %10 : vector<2x128xf32> to vector<1x2x128xf32>
    tpu.vector_store %arg3[%c0_9, %c0_10, %c0_11], %13 {strides = array<i32>} : memref<3x2x128xf32, #tpu.memory_space<vmem>>, vector<1x2x128xf32>,
    %c1 = arith.constant 1 : index
    %c0_12 = arith.constant 0 : index
    %c0_13 = arith.constant 0 : index
    %14 = vector.load %arg0[%c1, %c0_12, %c0_13] : memref<3x2x128xf32, #tpu.memory_space<vmem>>, vector<1x2x128xf32>
    %15 = vector.shape_cast %14 : vector<1x2x128xf32> to vector<2x128xf32>
    %c1_14 = arith.constant 1 : index
    %c0_15 = arith.constant 0 : index
    %c0_16 = arith.constant 0 : index
    %16 = vector.load %arg1[%c1_14, %c0_15, %c0_16] : memref<3x128x128xf32, #tpu.memory_space<vmem>>, vector<1x128x128xf32>
    %17 = vector.shape_cast %16 : vector<1x128x128xf32> to vector<128x128xf32>
    %cst_17 = arith.constant dense<0.000000e+00> : vector<2x128xf32>
    %18 = tpu.matmul %15, %17, %cst_17 {dimension_numbers = #tpu.dot_dimension_numbers<[1], [0], [0], [1], [0, 0, 1, 1], [], []>} : vector<2x128xf32>, vector<128x128xf32>, vector<2x128xf32> -> vector<2x128xf32>
    %c1_18 = arith.constant 1 : index
    %c0_19 = arith.constant 0 : index
    %c0_20 = arith.constant 0 : index
    %19 = vector.load %arg2[%c1_18, %c0_19, %c0_20] : memref<3x1x128xf32, #tpu.memory_space<vmem>>, vector<1x1x128xf32>
    %20 = vector.shape_cast %19 : vector<1x1x128xf32> to vector<1x128xf32>
    %21 = vector.broadcast %20 : vector<1x128xf32> to vector<2x128xf32>
    %22 = arith.addf %18, %21 : vector<2x128xf32>
    %cst_21 = arith.constant 0.000000e+00 : f32
    %23 = vector.broadcast %cst_21 : f32 to vector<2x128xf32>
    %24 = arith.maximumf %22, %23 : vector<2x128xf32>
    %c1_22 = arith.constant 1 : index
    %c0_23 = arith.constant 0 : index
    %c0_24 = arith.constant 0 : index
    %25 = vector.load %arg3[%c1_22, %c0_23, %c0_24] : memref<3x2x128xf32, #tpu.memory_space<vmem>>, vector<1x2x128xf32>
    %26 = vector.shape_cast %25 : vector<1x2x128xf32> to vector<2x128xf32>
    %27 = vector.shape_cast %24 : vector<2x128xf32> to vector<1x2x128xf32>
    tpu.vector_store %arg3[%c1_22, %c0_23, %c0_24], %27 {strides = array<i32>} : memref<3x2x128xf32, #tpu.memory_space<vmem>>, vector<1x2x128xf32>,
    %c2 = arith.constant 2 : index
    %c0_25 = arith.constant 0 : index
    %c0_26 = arith.constant 0 : index
    %28 = vector.load %arg0[%c2, %c0_25, %c0_26] : memref<3x2x128xf32, #tpu.memory_space<vmem>>, vector<1x2x128xf32>
    %29 = vector.shape_cast %28 : vector<1x2x128xf32> to vector<2x128xf32>
    %c2_27 = arith.constant 2 : index
    %c0_28 = arith.constant 0 : index
    %c0_29 = arith.constant 0 : index
    %30 = vector.load %arg1[%c2_27, %c0_28, %c0_29] : memref<3x128x128xf32, #tpu.memory_space<vmem>>, vector<1x128x128xf32>
    %31 = vector.shape_cast %30 : vector<1x128x128xf32> to vector<128x128xf32>
    %cst_30 = arith.constant dense<0.000000e+00> : vector<2x128xf32>
    %32 = tpu.matmul %29, %31, %cst_30 {dimension_numbers = #tpu.dot_dimension_numbers<[1], [0], [0], [1], [0, 0, 1, 1], [], []>} : vector<2x128xf32>, vector<128x128xf32>, vector<2x128xf32> -> vector<2x128xf32>
    %c2_31 = arith.constant 2 : index
    %c0_32 = arith.constant 0 : index
    %c0_33 = arith.constant 0 : index
    %33 = vector.load %arg2[%c2_31, %c0_32, %c0_33] : memref<3x1x128xf32, #tpu.memory_space<vmem>>, vector<1x1x128xf32>
    %34 = vector.shape_cast %33 : vector<1x1x128xf32> to vector<1x128xf32>
    %35 = vector.broadcast %34 : vector<1x128xf32> to vector<2x128xf32>
    %36 = arith.addf %32, %35 : vector<2x128xf32>
    %cst_34 = arith.constant 0.000000e+00 : f32
    %37 = vector.broadcast %cst_34 : f32 to vector<2x128xf32>
    %38 = arith.maximumf %36, %37 : vector<2x128xf32>
    %c2_35 = arith.constant 2 : index
    %c0_36 = arith.constant 0 : index
    %c0_37 = arith.constant 0 : index
    %39 = vector.load %arg3[%c2_35, %c0_36, %c0_37] : memref<3x2x128xf32, #tpu.memory_space<vmem>>, vector<1x2x128xf32>
    %40 = vector.shape_cast %39 : vector<1x2x128xf32> to vector<2x128xf32>
    %41 = vector.shape_cast %38 : vector<2x128xf32> to vector<1x2x128xf32>
    tpu.vector_store %arg3[%c2_35, %c0_36, %c0_37], %41 {strides = array<i32>} : memref<3x2x128xf32, #tpu.memory_space<vmem>>, vector<1x2x128xf32>,
    return
  }
}

</mosaic_0001>

<bundles_post_ra>
// kernel: squeeze.5
= control target key start
LH: loop header
LB: loop body
LE: loop exit
PB: predicated region body
PF: predicated region fallthrough
CT: control target
= control target key end

     0   :  { %s354_s8 = smov 116   ;;  %s355_s9 = smov 120   ;;  %vm7_vm0 = vcmask 31744   ;;  %s653_s0 = inlined_call_operand.vmem [shape: f32[1,2,128], index: 0, kind: input, shape index: {}]   ;;  %s654_s1 = inlined_call_operand.vmem [shape: f32[2,32,4], index: 1, kind: output, shape index: {}]  }
   0x1   :  { %v4_v0 = vld [vmem:[%s653_s0] sm:$0x3]  ;;  %s353_s0 = smov 124   ;;  %s356_s10 = smov 112  }
   0x2   :  { %5 = vst [vmem:[#allocation0] sm:$0x3] %v4_v0  ;;  %s357_s11 = smov 108   ;;  %s358_s12 = smov 104  }
   0x3   :  { %s359_s13 = smov 100   ;;  %s360_s14 = smov 96  }
   0x4   :  { %s361_s15 = smov 92   ;;  %s362_s16 = smov 88  }
   0x5   :  { %s363_s17 = smov 84   ;;  %s364_s18 = smov 80  }
   0x6   :  { %s365_s19 = smov 76   ;;  %s366_s20 = smov 72  }
   0x7   :  { %s367_s21 = smov 68   ;;  %s368_s22 = smov 64  }
   0x8   :  { %s369_s23 = smov 60   ;;  %s370_s24 = smov 56  }
   0x9   :  { %v11_v1 = vld [vmem:[#allocation0] sm:$0x3]   ;;  %s371_s25 = smov 52   ;;  %s372_s26 = smov 48  }
   0xa   :  { %v27_v2 = vld [vmem:[#allocation0] sm:$0x3]   ;;  %12 = vrot.lane.b32.xlu0 %v11_v1, %s353_s0  ;;  %s373_s27 = smov 44   ;;  %s374_s28 = smov 40  }
   0xb   :  { %28 = vrot.lane.b32.xlu1 %v27_v2, %s354_s8  ;;  %v19_v3 = vld [vmem:[#allocation0] sm:$0x3]   ;;  %s375_s29 = smov 36   ;;  %s376_s30 = smov 32  }
   0xc   :  { %v35_v4 = vld [vmem:[#allocation0] sm:$0x3]   ;;  %s377_s6 = smov 28   ;;  %s378_s7 = smov 24  }
   0xd   :  { %v43_v5 = vld [vmem:[#allocation0] sm:$0x3]   ;;  %s379_s0 = smov 20   ;;  %s380_s8 = smov 16  }
   0xe   :  { %20 = vrot.lane.b32.xlu0 %v19_v3, %s355_s9  ;;  %v51_v6 = vld [vmem:[#allocation0] sm:$0x3]   ;;  %s381_s9 = smov 12  }
   0xf   :  { %36 = vrot.lane.b32.xlu1 %v35_v4, %s356_s10  ;;  %v59_v7 = vld [vmem:[#allocation0] sm:$0x3]   ;;  %s382_s10 = smov 8  }
  0x10   :  { %v67_v8 = vld [vmem:[#allocation0] sm:$0x3]  }
  0x11   :  { %v75_v9 = vld [vmem:[#allocation0] sm:$0x3]  }
  0x12   :  { %44 = vrot.lane.b32.xlu0 %v43_v5, %s357_s11  ;;  %v83_v10 = vld [vmem:[#allocation0] sm:$0x3]   ;;  %s383_s11 = smov 4  }
  0x13   :  { %52 = vrot.lane.b32.xlu1 %v51_v6, %s358_s12  ;;  %v91_v11 = vld [vmem:[#allocation0] sm:$0x3]  }
  0x14   :  { %v99_v12 = vld [vmem:[#allocation0] sm:$0x3]  }
  0x15   :  { %v107_v13 = vld [vmem:[#allocation0] sm:$0x3]  }
  0x16   :  { %60 = vrot.lane.b32.xlu0 %v59_v7, %s359_s13  ;;  %v115_v14 = vld [vmem:[#allocation0] sm:$0x3]  }
  0x17   :  { %68 = vrot.lane.b32.xlu1 %v67_v8, %s360_s14  ;;  %v123_v15 = vld [vmem:[#allocation0] sm:$0x3]  }
  0x18   :  { %v131_v16 = vld [vmem:[#allocation0] sm:$0x3]  }
  0x19   :  { %v139_v17 = vld [vmem:[#allocation0] sm:$0x3]  }
  0x1a   :  { %76 = vrot.lane.b32.xlu0 %v75_v9, %s361_s15  ;;  %v147_v18 = vld [vmem:[#allocation0] sm:$0x3]  }
  0x1b   :  { %84 = vrot.lane.b32.xlu1 %v83_v10, %s362_s16  ;;  %v155_v19 = vld [vmem:[#allocation0] sm:$0x3]  }
  0x1c   :  { %v163_v20 = vld [vmem:[#allocation0] sm:$0x3]  }
  0x1d   :  { %v171_v21 = vld [vmem:[#allocation0] sm:$0x3]  }
  0x1e   :  { %92 = vrot.lane.b32.xlu0 %v91_v11, %s363_s17  ;;  %v179_v22 = vld [vmem:[#allocation0] sm:$0x3]  }
  0x1f   :  { %100 = vrot.lane.b32.xlu1 %v99_v12, %s364_s18  ;;  %v187_v23 = vld [vmem:[#allocation0] sm:$0x3]  }
  0x20   :  { %v195_v24 = vld [vmem:[#allocation0] sm:$0x3]  }
  0x21   :  { %v203_v25 = vld [vmem:[#allocation0] sm:$0x3]  }
  0x22   :  { %108 = vrot.lane.b32.xlu0 %v107_v13, %s365_s19  ;;  %v211_v26 = vld [vmem:[#allocation0] sm:$0x3]  }
  0x23   :  { %116 = vrot.lane.b32.xlu1 %v115_v14, %s366_s20  ;;  %v6_v27 = vld [vmem:[#allocation0] sm:$0x3]  }
  0x24   :  { %8 = vst.msk [vmem:[%s654_s1] sm:$0x1] %vm7_vm0, %v6_v27   ;;  %259 = vst.msk [vmem:[%s654_s1 + $0x1f] sm:$0x2] %vm7_vm0, %v6_v27   ;;  %v219_v28 = vld [vmem:[#allocation0] sm:$0x3]  }
  0x25   :  { %v227_v29 = vld [vmem:[#allocation0] sm:$0x3]  }
  0x26   :  { %124 = vrot.lane.b32.xlu0 %v123_v15, %s367_s21  ;;  %v235_v30 = vld [vmem:[#allocation0] sm:$0x3]  }
  0x27   :  { %132 = vrot.lane.b32.xlu1 %v131_v16, %s368_s22  ;;  %v243_v31 = vld [vmem:[#allocation0] sm:$0x3]  }
  0x28   :  { %v251_v32 = vld [vmem:[#allocation0] sm:$0x3]  }
  0x2a   :  { %140 = vrot.lane.b32.xlu0 %v139_v17, %s369_s23 }
  0x2b   :  { %148 = vrot.lane.b32.xlu1 %v147_v18, %s370_s24 }
  0x2e   :  { %156 = vrot.lane.b32.xlu0 %v155_v19, %s371_s25 }
  0x2f   :  { %164 = vrot.lane.b32.xlu1 %v163_v20, %s372_s26 }
  0x32   :  { %172 = vrot.lane.b32.xlu0 %v171_v21, %s373_s27 }
  0x33   :  { %180 = vrot.lane.b32.xlu1 %v179_v22, %s374_s28 }
  0x36   :  { %188 = vrot.lane.b32.xlu0 %v187_v23, %s375_s29 }
  0x37   :  { %196 = vrot.lane.b32.xlu1 %v195_v24, %s376_s30 }
  0x3a   :  { %204 = vrot.lane.b32.xlu0 %v203_v25, %s377_s6 }
  0x3b   :  { %212 = vrot.lane.b32.xlu1 %v211_v26, %s378_s7 }
  0x3e   :  { %220 = vrot.lane.b32.xlu0 %v219_v28, %s379_s0 }
  0x3f   :  { %228 = vrot.lane.b32.xlu1 %v227_v29, %s380_s8 }
  0x42   :  { %236 = vrot.lane.b32.xlu0 %v235_v30, %s381_s9 }
  0x43   :  { %244 = vrot.lane.b32.xlu1 %v243_v31, %s382_s10 }
  0x46   :  { %252 = vrot.lane.b32.xlu0 %v251_v32, %s383_s11 }
  0x7c   :  { %v13_v33 = vpop.permute.xlu0 %12  }
  0x7d   :  { %v29_v34 = vpop.permute.xlu1 %28   ;;  %260 = vst.msk [vmem:[%s654_s1 + $0x1] sm:$0x1] %vm7_vm0, %v13_v33   ;;  %261 = vst.msk [vmem:[%s654_s1 + $0x20] sm:$0x2] %vm7_vm0, %v13_v33  }
  0x7e   :  { %264 = vst.msk [vmem:[%s654_s1 + $0x3] sm:$0x1] %vm7_vm0, %v29_v34   ;;  %265 = vst.msk [vmem:[%s654_s1 + $0x22] sm:$0x2] %vm7_vm0, %v29_v34  }
  0x80   :  { %v21_v35 = vpop.permute.xlu0 %20  }
  0x81   :  { %v37_v36 = vpop.permute.xlu1 %36   ;;  %262 = vst.msk [vmem:[%s654_s1 + $0x2] sm:$0x1] %vm7_vm0, %v21_v35   ;;  %263 = vst.msk [vmem:[%s654_s1 + $0x21] sm:$0x2] %vm7_vm0, %v21_v35  }
  0x82   :  { %266 = vst.msk [vmem:[%s654_s1 + $0x4] sm:$0x1] %vm7_vm0, %v37_v36   ;;  %267 = vst.msk [vmem:[%s654_s1 + $0x23] sm:$0x2] %vm7_vm0, %v37_v36  }
  0x84   :  { %v45_v37 = vpop.permute.xlu0 %44  }
  0x85   :  { %v53_v38 = vpop.permute.xlu1 %52   ;;  %268 = vst.msk [vmem:[%s654_s1 + $0x5] sm:$0x1] %vm7_vm0, %v45_v37   ;;  %269 = vst.msk [vmem:[%s654_s1 + $0x24] sm:$0x2] %vm7_vm0, %v45_v37  }
  0x86   :  { %270 = vst.msk [vmem:[%s654_s1 + $0x6] sm:$0x1] %vm7_vm0, %v53_v38   ;;  %271 = vst.msk [vmem:[%s654_s1 + $0x25] sm:$0x2] %vm7_vm0, %v53_v38  }
  0x88   :  { %v61_v39 = vpop.permute.xlu0 %60  }
  0x89   :  { %v69_v40 = vpop.permute.xlu1 %68   ;;  %272 = vst.msk [vmem:[%s654_s1 + $0x7] sm:$0x1] %vm7_vm0, %v61_v39   ;;  %273 = vst.msk [vmem:[%s654_s1 + $0x26] sm:$0x2] %vm7_vm0, %v61_v39  }
  0x8a   :  { %274 = vst.msk [vmem:[%s654_s1 + $0x8] sm:$0x1] %vm7_vm0, %v69_v40   ;;  %275 = vst.msk [vmem:[%s654_s1 + $0x27] sm:$0x2] %vm7_vm0, %v69_v40  }
  0x8c   :  { %v77_v41 = vpop.permute.xlu0 %76  }
  0x8d   :  { %v85_v42 = vpop.permute.xlu1 %84   ;;  %276 = vst.msk [vmem:[%s654_s1 + $0x9] sm:$0x1] %vm7_vm0, %v77_v41   ;;  %277 = vst.msk [vmem:[%s654_s1 + $0x28] sm:$0x2] %vm7_vm0, %v77_v41  }
  0x8e   :  { %278 = vst.msk [vmem:[%s654_s1 + $0xa] sm:$0x1] %vm7_vm0, %v85_v42   ;;  %279 = vst.msk [vmem:[%s654_s1 + $0x29] sm:$0x2] %vm7_vm0, %v85_v42  }
  0x90   :  { %v93_v43 = vpop.permute.xlu0 %92  }
  0x91   :  { %v101_v44 = vpop.permute.xlu1 %100   ;;  %280 = vst.msk [vmem:[%s654_s1 + $0xb] sm:$0x1] %vm7_vm0, %v93_v43   ;;  %281 = vst.msk [vmem:[%s654_s1 + $0x2a] sm:$0x2] %vm7_vm0, %v93_v43  }
  0x92   :  { %282 = vst.msk [vmem:[%s654_s1 + $0xc] sm:$0x1] %vm7_vm0, %v101_v44   ;;  %283 = vst.msk [vmem:[%s654_s1 + $0x2b] sm:$0x2] %vm7_vm0, %v101_v44  }
  0x94   :  { %v109_v45 = vpop.permute.xlu0 %108  }
  0x95   :  { %v117_v46 = vpop.permute.xlu1 %116   ;;  %284 = vst.msk [vmem:[%s654_s1 + $0xd] sm:$0x1] %vm7_vm0, %v109_v45   ;;  %285 = vst.msk [vmem:[%s654_s1 + $0x2c] sm:$0x2] %vm7_vm0, %v109_v45  }
  0x96   :  { %286 = vst.msk [vmem:[%s654_s1 + $0xe] sm:$0x1] %vm7_vm0, %v117_v46   ;;  %287 = vst.msk [vmem:[%s654_s1 + $0x2d] sm:$0x2] %vm7_vm0, %v117_v46  }
  0x98   :  { %v125_v47 = vpop.permute.xlu0 %124  }
  0x99   :  { %v133_v48 = vpop.permute.xlu1 %132   ;;  %288 = vst.msk [vmem:[%s654_s1 + $0xf] sm:$0x1] %vm7_vm0, %v125_v47   ;;  %289 = vst.msk [vmem:[%s654_s1 + $0x2e] sm:$0x2] %vm7_vm0, %v125_v47  }
  0x9a   :  { %290 = vst.msk [vmem:[%s654_s1 + $0x10] sm:$0x1] %vm7_vm0, %v133_v48   ;;  %291 = vst.msk [vmem:[%s654_s1 + $0x2f] sm:$0x2] %vm7_vm0, %v133_v48  }
  0x9c   :  { %v141_v49 = vpop.permute.xlu0 %140  }
  0x9d   :  { %v149_v50 = vpop.permute.xlu1 %148   ;;  %292 = vst.msk [vmem:[%s654_s1 + $0x11] sm:$0x1] %vm7_vm0, %v141_v49   ;;  %293 = vst.msk [vmem:[%s654_s1 + $0x30] sm:$0x2] %vm7_vm0, %v141_v49  }
  0x9e   :  { %294 = vst.msk [vmem:[%s654_s1 + $0x12] sm:$0x1] %vm7_vm0, %v149_v50   ;;  %295 = vst.msk [vmem:[%s654_s1 + $0x31] sm:$0x2] %vm7_vm0, %v149_v50  }
  0xa0   :  { %v157_v51 = vpop.permute.xlu0 %156  }
  0xa1   :  { %v165_v52 = vpop.permute.xlu1 %164   ;;  %296 = vst.msk [vmem:[%s654_s1 + $0x13] sm:$0x1] %vm7_vm0, %v157_v51   ;;  %297 = vst.msk [vmem:[%s654_s1 + $0x32] sm:$0x2] %vm7_vm0, %v157_v51  }
  0xa2   :  { %298 = vst.msk [vmem:[%s654_s1 + $0x14] sm:$0x1] %vm7_vm0, %v165_v52   ;;  %299 = vst.msk [vmem:[%s654_s1 + $0x33] sm:$0x2] %vm7_vm0, %v165_v52  }
  0xa4   :  { %v173_v53 = vpop.permute.xlu0 %172  }
  0xa5   :  { %v181_v54 = vpop.permute.xlu1 %180   ;;  %300 = vst.msk [vmem:[%s654_s1 + $0x15] sm:$0x1] %vm7_vm0, %v173_v53   ;;  %301 = vst.msk [vmem:[%s654_s1 + $0x34] sm:$0x2] %vm7_vm0, %v173_v53  }
  0xa6   :  { %302 = vst.msk [vmem:[%s654_s1 + $0x16] sm:$0x1] %vm7_vm0, %v181_v54   ;;  %303 = vst.msk [vmem:[%s654_s1 + $0x35] sm:$0x2] %vm7_vm0, %v181_v54  }
  0xa8   :  { %v189_v55 = vpop.permute.xlu0 %188  }
  0xa9   :  { %v197_v56 = vpop.permute.xlu1 %196   ;;  %304 = vst.msk [vmem:[%s654_s1 + $0x17] sm:$0x1] %vm7_vm0, %v189_v55   ;;  %305 = vst.msk [vmem:[%s654_s1 + $0x36] sm:$0x2] %vm7_vm0, %v189_v55  }
  0xaa   :  { %306 = vst.msk [vmem:[%s654_s1 + $0x18] sm:$0x1] %vm7_vm0, %v197_v56   ;;  %307 = vst.msk [vmem:[%s654_s1 + $0x37] sm:$0x2] %vm7_vm0, %v197_v56  }
  0xac   :  { %v205_v57 = vpop.permute.xlu0 %204  }
  0xad   :  { %v213_v58 = vpop.permute.xlu1 %212   ;;  %308 = vst.msk [vmem:[%s654_s1 + $0x19] sm:$0x1] %vm7_vm0, %v205_v57   ;;  %309 = vst.msk [vmem:[%s654_s1 + $0x38] sm:$0x2] %vm7_vm0, %v205_v57  }
  0xae   :  { %310 = vst.msk [vmem:[%s654_s1 + $0x1a] sm:$0x1] %vm7_vm0, %v213_v58   ;;  %311 = vst.msk [vmem:[%s654_s1 + $0x39] sm:$0x2] %vm7_vm0, %v213_v58  }
  0xb0   :  { %v221_v59 = vpop.permute.xlu0 %220  }
  0xb1   :  { %v229_v60 = vpop.permute.xlu1 %228   ;;  %312 = vst.msk [vmem:[%s654_s1 + $0x1b] sm:$0x1] %vm7_vm0, %v221_v59   ;;  %313 = vst.msk [vmem:[%s654_s1 + $0x3a] sm:$0x2] %vm7_vm0, %v221_v59  }
  0xb2   :  { %314 = vst.msk [vmem:[%s654_s1 + $0x1c] sm:$0x1] %vm7_vm0, %v229_v60   ;;  %315 = vst.msk [vmem:[%s654_s1 + $0x3b] sm:$0x2] %vm7_vm0, %v229_v60  }
  0xb4   :  { %v237_v61 = vpop.permute.xlu0 %236  }
  0xb5   :  { %v245_v62 = vpop.permute.xlu1 %244   ;;  %316 = vst.msk [vmem:[%s654_s1 + $0x1d] sm:$0x1] %vm7_vm0, %v237_v61   ;;  %317 = vst.msk [vmem:[%s654_s1 + $0x3c] sm:$0x2] %vm7_vm0, %v237_v61  }
  0xb6   :  { %318 = vst.msk [vmem:[%s654_s1 + $0x1e] sm:$0x1] %vm7_vm0, %v245_v62   ;;  %319 = vst.msk [vmem:[%s654_s1 + $0x3d] sm:$0x2] %vm7_vm0, %v245_v62  }
  0xb8   :  { %v253_v63 = vpop.permute.xlu0 %252  }
  0xb9   :  { %320 = vst.msk [vmem:[%s654_s1 + $0x1f] sm:$0x1] %vm7_vm0, %v253_v63   ;;  %321 = vst.msk [vmem:[%s654_s1 + $0x3e] sm:$0x2] %vm7_vm0, %v253_v63  }

// kernel: _forward_impl.1
= control target key start
LH: loop header
LB: loop body
LE: loop exit
PB: predicated region body
PF: predicated region fallthrough
CT: control target
= control target key end

     0   :  { %v586_v0 = vmov 0.0|0.0   ;;  %vm587_vm0 = vmmov 0   ;;  %v588_v4 = vmov 0.0   ;;  %s810_s1 = inlined_call_operand.vmem [shape: f32[3,128,128], index: 1, kind: input, shape index: {}]   ;;  %s811_s0 = inlined_call_operand.vmem [shape: f32[3,2,128], index: 0, kind: input, shape index: {}]   ;;  %s812_s2 = inlined_call_operand.vmem [shape: f32[3,1,128], index: 2, kind: input, shape index: {}]   ;;  %s813_s3 = inlined_call_operand.vmem [shape: f32[3,2,128], index: 3, kind: output, shape index: {}]  }
   0x1   :  { %511 = vmatprep.subr.bf16.mxu0 %v586_v0  ;;  %v15_v1 = vld [vmem:[%s810_s1] sm:$0xff]  ;;  %v16_v2 = vld [vmem:[%s810_s1 + $0x8] sm:$0xff]  ;;  %v17_v3 = vld [vmem:[%s810_s1 + $0x10] sm:$0xff]  ;;  %438 = vmatprep.mubr.msk.f32.mxu0 %vm587_vm0, %v588_v4 }
   0x2   :  { %v512_v5 = vpack.c.bf16 %v16_v2, %v15_v1  ;;  %v18_v6 = vld [vmem:[%s810_s1 + $0x18] sm:$0xff]  ;;  %535 = vmatprep.subr.bf16.mxu1 %v586_v0  ;;  %473 = vmatprep.mubr.msk.f32.mxu1 %vm587_vm0, %v588_v4  ;;  %v19_v8 = vld [vmem:[%s810_s1 + $0x20] sm:$0xff]  ;;  %v20_v9 = vld [vmem:[%s810_s1 + $0x28] sm:$0xff] }
   0x3   :  { %v515_v7 = vpack.c.bf16 %v18_v6, %v17_v3  ;;  %v316_v10 = vld [vmem:[%s810_s1 + $0x80] sm:$0xff]  ;;  %v317_v11 = vld [vmem:[%s810_s1 + $0x88] sm:$0xff]  ;;  %v518_v12 = vpack.c.bf16 %v20_v9, %v19_v8  ;;  %v318_v14 = vld [vmem:[%s810_s1 + $0x90] sm:$0xff] }
   0x4   :  { %513 = vmatpush3.bf16.msra.mxu0 %v512_v5  ;;  %v536_v13 = vpack.c.bf16 %v317_v11, %v316_v10  ;;  %v319_v15 = vld [vmem:[%s810_s1 + $0x98] sm:$0xff]  ;;  %v21_v16 = vld [vmem:[%s810_s1 + $0x30] sm:$0xff]  ;;  %v320_v19 = vld [vmem:[%s810_s1 + $0xa0] sm:$0xff] }
   0x5   :  { %514 = vmatprep.subr.bf16.mxu0 %v586_v0  ;;  %v22_v17 = vld [vmem:[%s810_s1 + $0x38] sm:$0xff]  ;;  %v539_v18 = vpack.c.bf16 %v319_v15, %v318_v14  ;;  %v321_v20 = vld [vmem:[%s810_s1 + $0xa8] sm:$0xff]  ;;  %v23_v22 = vld [vmem:[%s810_s1 + $0x40] sm:$0xff] }
   0x6   :  { %537 = vmatpush3.bf16.msra.mxu1 %v536_v13  ;;  %v521_v21 = vpack.c.bf16 %v22_v17, %v21_v16  ;;  %v24_v23 = vld [vmem:[%s810_s1 + $0x48] sm:$0xff]  ;;  %v542_v24 = vpack.c.bf16 %v321_v20, %v320_v19  ;;  %v322_v25 = vld [vmem:[%s810_s1 + $0xb0] sm:$0xff]  ;;  %v323_v26 = vld [vmem:[%s810_s1 + $0xb8] sm:$0xff] }
   0x7   :  { %538 = vmatprep.subr.bf16.mxu1 %v586_v0  ;;  %v524_v27 = vpack.c.bf16 %v24_v23, %v23_v22  ;;  %v25_v28 = vld [vmem:[%s810_s1 + $0x50] sm:$0xff]  ;;  %v26_v29 = vld [vmem:[%s810_s1 + $0x58] sm:$0xff]  ;;  %v545_v30 = vpack.c.bf16 %v323_v26, %v322_v25  ;;  %v324_v31 = vld [vmem:[%s810_s1 + $0xc0] sm:$0xff] }
   0x8   :  { %516 = vmatpush3.bf16.msra.mxu0 %v515_v7  ;;  %v325_v32 = vld [vmem:[%s810_s1 + $0xc8] sm:$0xff]  ;;  %v527_v33 = vpack.c.bf16 %v26_v29, %v25_v28  ;;  %v27_v34 = vld [vmem:[%s810_s1 + $0x60] sm:$0xff]  ;;  %v326_v37 = vld [vmem:[%s810_s1 + $0xd0] sm:$0xff] }
   0x9   :  { %517 = vmatprep.subr.bf16.mxu0 %v586_v0  ;;  %v28_v35 = vld [vmem:[%s810_s1 + $0x68] sm:$0xff]  ;;  %v548_v36 = vpack.c.bf16 %v325_v32, %v324_v31  ;;  %v327_v38 = vld [vmem:[%s810_s1 + $0xd8] sm:$0xff]  ;;  %v29_v40 = vld [vmem:[%s810_s1 + $0x70] sm:$0xff] }
   0xa   :  { %540 = vmatpush3.bf16.msra.mxu1 %v539_v18  ;;  %v530_v39 = vpack.c.bf16 %v28_v35, %v27_v34  ;;  %v30_v41 = vld [vmem:[%s810_s1 + $0x78] sm:$0xff]  ;;  %v551_v42 = vpack.c.bf16 %v327_v38, %v326_v37  ;;  %v328_v43 = vld [vmem:[%s810_s1 + $0xe0] sm:$0xff]  ;;  %v329_v44 = vld [vmem:[%s810_s1 + $0xe8] sm:$0xff] }
   0xb   :  { %541 = vmatprep.subr.bf16.mxu1 %v586_v0  ;;  %v533_v45 = vpack.c.bf16 %v30_v41, %v29_v40  ;;  %v336_v46 = vld [vmem:[%s810_s1 + $0x100] sm:$0xff]  ;;  %v337_v47 = vld [vmem:[%s810_s1 + $0x108] sm:$0xff]  ;;  %v554_v48 = vpack.c.bf16 %v329_v44, %v328_v43  ;;  %v330_v49 = vld [vmem:[%s810_s1 + $0xf0] sm:$0xff] }
   0xc   :  { %519 = vmatpush3.bf16.msra.mxu0 %v518_v12  ;;  %v331_v50 = vld [vmem:[%s810_s1 + $0xf8] sm:$0xff]  ;;  %v14_v51 = vld [vmem:[%s811_s0] sm:$0x3]  ;;  %v560_v52 = vpack.c.bf16 %v337_v47, %v336_v46  ;;  %v338_v53 = vld [vmem:[%s810_s1 + $0x110] sm:$0xff] }
   0xd   :  { %520 = vmatprep.subr.bf16.mxu0 %v586_v0  ;;  %v339_v54 = vld [vmem:[%s810_s1 + $0x118] sm:$0xff]  ;;  %v557_v55 = vpack.c.bf16 %v331_v50, %v330_v49  ;;  %v340_v57 = vld [vmem:[%s810_s1 + $0x120] sm:$0xff]  ;;  %v341_v58 = vld [vmem:[%s810_s1 + $0x128] sm:$0xff] }
   0xe   :  { %543 = vmatpush3.bf16.msra.mxu1 %v542_v24  ;;  %v563_v56 = vpack.c.bf16 %v339_v54, %v338_v53  ;;  %v315_v59 = vld [vmem:[%s811_s0 + $0x2] sm:$0x3]  ;;  %v566_v60 = vpack.c.bf16 %v341_v58, %v340_v57  ;;  %v342_v61 = vld [vmem:[%s810_s1 + $0x130] sm:$0xff]  ;;  %v343_v62 = vld [vmem:[%s810_s1 + $0x138] sm:$0xff] }
   0xf   :  { %544 = vmatprep.subr.bf16.mxu1 %v586_v0  ;;  %v569_v63 = vpack.c.bf16 %v343_v62, %v342_v61  ;;  %v344_v1 = vld [vmem:[%s810_s1 + $0x140] sm:$0xff]  ;;  %v345_v2 = vld [vmem:[%s810_s1 + $0x148] sm:$0xff]  ;;  %v347_v5 = vld [vmem:[%s810_s1 + $0x158] sm:$0xff] }
  0x10   :  { %522 = vmatpush3.bf16.msra.mxu0 %v521_v21  ;;  %v572_v3 = vpack.c.bf16 %v345_v2, %v344_v1  ;;  %v348_v7 = vld [vmem:[%s810_s1 + $0x160] sm:$0xff]  ;;  %v349_v8 = vld [vmem:[%s810_s1 + $0x168] sm:$0xff]  ;;  %v350_v10 = vld [vmem:[%s810_s1 + $0x170] sm:$0xff] }
  0x11   :  { %523 = vmatprep.subr.bf16.mxu0 %v586_v0  ;;  %v578_v9 = vpack.c.bf16 %v349_v8, %v348_v7  ;;  %v351_v11 = vld [vmem:[%s810_s1 + $0x178] sm:$0xff]  ;;  %v335_v13 = vld [vmem:[%s811_s0 + $0x4] sm:$0x3]  ;;  %v314_v14 = vld [vmem:[%s812_s2] ss:$0 sm:$0xff] }
  0x12   :  { %546 = vmatpush3.bf16.msra.mxu1 %v545_v30  ;;  %v581_v12 = vpack.c.bf16 %v351_v11, %v350_v10  ;;  %v333_v19 = vld [vmem:[%s812_s2 + $0x1] ss:$0 sm:$0xff]  ;;  %v353_v23 = vld [vmem:[%s812_s2 + $0x2] ss:$0 sm:$0xff] }
  0x13   :  { %547 = vmatprep.subr.bf16.mxu1 %v586_v0 }
  0x14   :  { %525 = vmatpush3.bf16.msra.mxu0 %v524_v27 }
  0x15   :  { %526 = vmatprep.subr.bf16.mxu0 %v586_v0 }
  0x16   :  { %549 = vmatpush3.bf16.msra.mxu1 %v548_v36 }
  0x17   :  { %550 = vmatprep.subr.bf16.mxu1 %v586_v0 }
  0x18   :  { %528 = vmatpush3.bf16.msra.mxu0 %v527_v33 }
  0x19   :  { %529 = vmatprep.subr.bf16.mxu0 %v586_v0 }
  0x1a   :  { %552 = vmatpush3.bf16.msra.mxu1 %v551_v42 }
  0x1b   :  { %553 = vmatprep.subr.bf16.mxu1 %v586_v0 }
  0x1c   :  { %531 = vmatpush3.bf16.msra.mxu0 %v530_v39 }
  0x1d   :  { %532 = vmatprep.subr.bf16.mxu0 %v586_v0 }
  0x1e   :  { %555 = vmatpush3.bf16.msra.mxu1 %v554_v48 }
  0x1f   :  { %556 = vmatprep.subr.bf16.mxu1 %v586_v0 }
  0x20   :  { %534 = vmatpush3.bf16.msra.mxu0 %v533_v45 }
  0x21   :  { %559 = vmatprep.subr.bf16.mxu0 %v586_v0 }
  0x22   :  { %558 = vmatpush3.bf16.msra.mxu1 %v557_v55 }
  0x23   :  { %439 = vmatmul.mubr.f32.vlgmr.msra.gmra.mrb[0].mxu0 %v14_v51 }
  0x24   :  { %561 = vmatpush3.bf16.msra.mxu0 %v560_v52  ;;  %508 = vmatprep.mubr.msk.f32.mxu0 %vm587_vm0, %v588_v4  ;;  %v346_v4 = vld [vmem:[%s810_s1 + $0x150] sm:$0xff] }
  0x25   :  { %562 = vmatprep.subr.bf16.mxu0 %v586_v0  ;;  %474 = vmatmul.mubr.f32.vlgmr.msra.gmra.mrb[0].mxu1 %v315_v59  ;;  %v575_v6 = vpack.c.bf16 %v347_v5, %v346_v4 }
  0x28   :  { %564 = vmatpush3.bf16.msra.mxu0 %v563_v56 }
  0x29   :  { %565 = vmatprep.subr.bf16.mxu0 %v586_v0 }
  0x2c   :  { %567 = vmatpush3.bf16.msra.mxu0 %v566_v60 }
  0x2d   :  { %568 = vmatprep.subr.bf16.mxu0 %v586_v0 }
  0x30   :  { %570 = vmatpush3.bf16.msra.mxu0 %v569_v63 }
  0x31   :  { %571 = vmatprep.subr.bf16.mxu0 %v586_v0 }
  0x34   :  { %573 = vmatpush3.bf16.msra.mxu0 %v572_v3 }
  0x35   :  { %574 = vmatprep.subr.bf16.mxu0 %v586_v0 }
  0x38   :  { %576 = vmatpush3.bf16.msra.mxu0 %v575_v6 }
  0x39   :  { %577 = vmatprep.subr.bf16.mxu0 %v586_v0 }
  0x3c   :  { %579 = vmatpush3.bf16.msra.mxu0 %v578_v9 }
  0x3d   :  { %580 = vmatprep.subr.bf16.mxu0 %v586_v0 }
  0x40   :  { %582 = vmatpush3.bf16.msra.mxu0 %v581_v12 }
  0x43   :  { %509 = vmatmul.mubr.f32.vlgmr.msra.gmra.mrb[2].mxu0 %v335_v13 }
  0xf6   :  { %v104_v15 = vpop.f32.mrb[0].mxu0 }
  0xf7   :  { %v105_v16 = vadd.f32 %v314_v14, %v104_v15  ;;  %v440_v17 = vpop.f32.mrb[1].mxu0 }
  0xf8   :  { %v203_v0 = vpop.f32.mrb[0].mxu1 }
  0xf9   :  { %v108_v18 = vmax.f32 %v105_v16, 0.0  ;;  %v204_v20 = vadd.f32 %v333_v19, %v203_v0  ;;  %v475_v21 = vpop.f32.mrb[1].mxu1 }
  0xfb   :  { %109 = vst [vmem:[%s813_s3] sm:$0x3] %v108_v18  ;;  %v207_v22 = vmax.f32 %v204_v20, 0.0 }
  0xfd   :  { %334 = vst [vmem:[%s813_s3 + $0x2] sm:$0x3] %v207_v22 }
 0x116   :  { %v303_v24 = vpop.f32.mrb[2].mxu0 }
 0x117   :  { %v304_v25 = vadd.f32 %v353_v23, %v303_v24  ;;  %v510_v26 = vpop.f32.mrb[3].mxu0 }
 0x119   :  { %v307_v27 = vmax.f32 %v304_v25, 0.0 }
 0x11b   :  { %354 = vst [vmem:[%s813_s3 + $0x4] sm:$0x3] %v307_v27 }

</bundles_post_ra>
